<compile_context>
chip_gen: v7x
topology: tpu7x:2x2x1
jax: 0.10.0
libtpu: 0.0.40
codegen_flags: <defaults>
</compile_context>

<pallas_src>
import functools

import jax
import jax.numpy as jnp
from jax.experimental import pallas as pl
from jax.experimental.pallas import tpu as pltpu

_LANES = 128


def _round_up(x, m):
    return (x + m - 1) // m * m


def _mlp_kernel(x_ref, w1_ref, b1_ref, w2_ref, b2_ref, w3_ref, b3_ref, o_ref,
                *, num_classes):
    # One batch tile per grid step; all three matmuls + ReLUs fused.
    # x arrives as f32; pack to bf16 on the VPU (free, hidden under DMA).
    x = x_ref[...].astype(jnp.bfloat16)  # (TB, D)

    # fc1 + ReLU  (dropout1 == identity in eval). bf16 MXU, f32 accumulate.
    h1 = jnp.dot(x, w1_ref[...], preferred_element_type=jnp.float32) + b1_ref[...]
    h1 = jnp.maximum(h1, 0.0)

    # fc2 + ReLU  (dropout2 == identity in eval)
    h2 = jnp.dot(h1.astype(jnp.bfloat16), w2_ref[...],
                 preferred_element_type=jnp.float32) + b2_ref[...]
    h2 = jnp.maximum(h2, 0.0)

    # fc3 (logits). Compute on the lane-padded (128-wide) w3 tile in VMEM,
    # but store only the real num_classes columns to HBM (masked vst).
    out = jnp.dot(h2.astype(jnp.bfloat16), w3_ref[...],
                  preferred_element_type=jnp.float32) + b3_ref[...]
    o_ref[...] = out[:, :num_classes].astype(o_ref.dtype)


def prepare_params(w1, b1, w2, b2, w3, b3):
    """One-time weight prep, hoisted out of the per-call path.

    Casts weights to bf16 (MXU-native), keeps biases in f32, and lane-pads
    w3/b3 to 128 output columns for a lane-dense MXU tile in VMEM.
    Returns (prepared_tuple, num_classes).
    """
    num_classes = w3.shape[1]
    ncp = _round_up(num_classes, _LANES)
    w3p = jnp.zeros((w3.shape[0], ncp), jnp.float32).at[:, :num_classes].set(w3)
    b3p = jnp.zeros((1, ncp), jnp.float32).at[:, :num_classes].set(b3)
    prepared = (
        w1.astype(jnp.bfloat16), b1.astype(jnp.float32),
        w2.astype(jnp.bfloat16), b2.astype(jnp.float32),
        w3p.astype(jnp.bfloat16), b3p.astype(jnp.float32),
    )
    return prepared, num_classes


@functools.partial(jax.jit, static_argnames=("num_classes", "tb"))
def enhanced_nn_forward(x, w1b, b1f, w2b, b2f, w3b, b3f, *, num_classes, tb=2048):
    B, D = x.shape
    H1 = w1b.shape[1]
    H2 = w2b.shape[1]
    ncp = w3b.shape[1]  # lane-padded fc3 width (compute-only)

    # Batch tile: multiple of 8 sublanes (f32 input), capped by the batch.
    # No wrapper-side zero-padding of x: Pallas handles the partial trailing
    # block (garbage rows are row-independent through the matmuls and their
    # output rows are never written).
    TB = _round_up(min(tb, _round_up(B, 8)), 8)
    grid = (pl.cdiv(B, TB),)

    const = lambda i: (0, 0)  # weights/biases: same (whole) block every step
    kernel = functools.partial(_mlp_kernel, num_classes=num_classes)

    out = pl.pallas_call(
        kernel,
        out_shape=jax.ShapeDtypeStruct((B, num_classes), jnp.float32),
        grid=grid,
        in_specs=[
            pl.BlockSpec((TB, D), lambda i: (i, 0)),   # x: streamed per tile (f32)
            pl.BlockSpec((D, H1), const),              # w1 (VMEM-resident)
            pl.BlockSpec((1, H1), const),              # b1
            pl.BlockSpec((H1, H2), const),             # w2
            pl.BlockSpec((1, H2), const),              # b2
            pl.BlockSpec((H2, ncp), const),            # w3 (lane-padded, compute only)
            pl.BlockSpec((1, ncp), const),             # b3 (lane-padded, compute only)
        ],
        # Narrow HBM output: last block dim equals full array dim (legal).
        out_specs=pl.BlockSpec((TB, num_classes), lambda i: (i, 0)),
        compiler_params=pltpu.CompilerParams(
            dimension_semantics=("parallel",),  # v7x: shard batch tiles on 2 TCs
        ),
    )(x, w1b, b1f, w2b, b2f, w3b, b3f)
    return out


def init_params(key, input_dim, num_classes):
    """Deterministic init matching PyTorch nn.Linear default:
    U(-1/sqrt(fan_in), 1/sqrt(fan_in)) for both weight and bias."""
    def linear(key, fan_in, fan_out):
        kw, kb = jax.random.split(key)
        bound = 1.0 / jnp.sqrt(jnp.float32(fan_in))
        # stored as (in, out) so the kernel does x @ W
        w = jax.random.uniform(kw, (fan_in, fan_out), jnp.float32, -bound, bound)
        b = jax.random.uniform(kb, (1, fan_out), jnp.float32, -bound, bound)
        return w, b

    k1, k2, k3 = jax.random.split(key, 3)
    w1, b1 = linear(k1, input_dim, 64)
    w2, b2 = linear(k2, 64, 32)
    w3, b3 = linear(k3, 32, num_classes)
    return w1, b1, w2, b2, w3, b3


if __name__ == "__main__":
    key = jax.random.PRNGKey(0)
    k_x, k_p = jax.random.split(key)

    batch = 8
    input_dim = 16     # number of tabular features
    num_classes = 4    # unique diagnosis labels

    x = jax.random.normal(k_x, (batch, input_dim), dtype=jnp.float32)
    raw_params = init_params(k_p, input_dim, num_classes)

    # Weight prep done once, outside the per-call path.
    prepared, nc = prepare_params(*raw_params)

    out = enhanced_nn_forward(x, *prepared, num_classes=nc)
    out = jax.block_until_ready(out)
    assert out.shape == (batch, num_classes)

    # Sanity check against a plain-JAX reference using the same bf16-input /
    # f32-accumulate recipe as the kernel.
    w1, b1, w2, b2, w3, b3 = raw_params
    xb = x.astype(jnp.bfloat16)
    ref = jnp.maximum(
        jnp.dot(xb, w1.astype(jnp.bfloat16),
                preferred_element_type=jnp.float32) + b1, 0.0)
    ref = jnp.maximum(
        jnp.dot(ref.astype(jnp.bfloat16), w2.astype(jnp.bfloat16),
                preferred_element_type=jnp.float32) + b2, 0.0)
    ref = jnp.dot(ref.astype(jnp.bfloat16), w3.astype(jnp.bfloat16),
                  preferred_element_type=jnp.float32) + b3
    assert jnp.allclose(out, ref, atol=1e-2, rtol=1e-2), (
        float(jnp.max(jnp.abs(out - ref))))

    print("KERNEL_OK")
</pallas_src>

<mosaic_0001>
module attributes {stable_mosaic.version = 11 : i64} {
  func.func @_mlp_kernel(%arg0: i32, %arg1: memref<8x16xf32, #tpu.memory_space<vmem>>, %arg2: memref<16x64xbf16, #tpu.memory_space<vmem>>, %arg3: memref<1x64xf32, #tpu.memory_space<vmem>>, %arg4: memref<64x32xbf16, #tpu.memory_space<vmem>>, %arg5: memref<1x32xf32, #tpu.memory_space<vmem>>, %arg6: memref<32x128xbf16, #tpu.memory_space<vmem>>, %arg7: memref<1x128xf32, #tpu.memory_space<vmem>>, %arg8: memref<8x4xf32, #tpu.memory_space<vmem>>) attributes {dimension_semantics = [#tpu.dimension_semantics<parallel>], iteration_bounds = array<i64: 1>, scalar_prefetch = 0 : i64, scratch_operands = 0 : i64, tpu.core_type = #tpu.core_type<tc>, window_params = [{transform_indices = @transform_0, window_bounds = array<i64: 8, 16>}, {pipeline_mode = #tpu.pipeline_mode<synchronous>, transform_indices = @transform_1, window_bounds = array<i64: 16, 64>}, {pipeline_mode = #tpu.pipeline_mode<synchronous>, transform_indices = @transform_2, window_bounds = array<i64: 1, 64>}, {pipeline_mode = #tpu.pipeline_mode<synchronous>, transform_indices = @transform_3, window_bounds = array<i64: 64, 32>}, {pipeline_mode = #tpu.pipeline_mode<synchronous>, transform_indices = @transform_4, window_bounds = array<i64: 1, 32>}, {pipeline_mode = #tpu.pipeline_mode<synchronous>, transform_indices = @transform_5, window_bounds = array<i64: 32, 128>}, {pipeline_mode = #tpu.pipeline_mode<synchronous>, transform_indices = @transform_6, window_bounds = array<i64: 1, 128>}, {transform_indices = @transform_7, window_bounds = array<i64: 8, 4>}]} {
    %c0 = arith.constant 0 : index
    %c0_0 = arith.constant 0 : index
    %0 = vector.load %arg1[%c0, %c0_0] : memref<8x16xf32, #tpu.memory_space<vmem>>, vector<8x16xf32>
    %1 = arith.truncf %0 : vector<8x16xf32> to vector<8x16xbf16>
    %c0_1 = arith.constant 0 : index
    %c0_2 = arith.constant 0 : index
    %2 = vector.load %arg2[%c0_1, %c0_2] : memref<16x64xbf16, #tpu.memory_space<vmem>>, vector<16x64xbf16>
    %cst = arith.constant dense<0.000000e+00> : vector<8x64xf32>
    %3 = tpu.matmul %1, %2, %cst {dimension_numbers = #tpu.dot_dimension_numbers<[1], [0], [0], [1], [0, 0, 1, 1], [], []>} : vector<8x16xbf16>, vector<16x64xbf16>, vector<8x64xf32> -> vector<8x64xf32>
    %c0_3 = arith.constant 0 : index
    %c0_4 = arith.constant 0 : index
    %4 = vector.load %arg3[%c0_3, %c0_4] : memref<1x64xf32, #tpu.memory_space<vmem>>, vector<1x64xf32>
    %5 = vector.broadcast %4 : vector<1x64xf32> to vector<8x64xf32>
    %6 = arith.addf %3, %5 : vector<8x64xf32>
    %cst_5 = arith.constant 0.000000e+00 : f32
    %7 = vector.broadcast %cst_5 : f32 to vector<8x64xf32>
    %8 = arith.maximumf %6, %7 : vector<8x64xf32>
    %9 = arith.truncf %8 : vector<8x64xf32> to vector<8x64xbf16>
    %c0_6 = arith.constant 0 : index
    %c0_7 = arith.constant 0 : index
    %10 = vector.load %arg4[%c0_6, %c0_7] : memref<64x32xbf16, #tpu.memory_space<vmem>>, vector<64x32xbf16>
    %cst_8 = arith.constant dense<0.000000e+00> : vector<8x32xf32>
    %11 = tpu.matmul %9, %10, %cst_8 {dimension_numbers = #tpu.dot_dimension_numbers<[1], [0], [0], [1], [0, 0, 1, 1], [], []>} : vector<8x64xbf16>, vector<64x32xbf16>, vector<8x32xf32> -> vector<8x32xf32>
    %c0_9 = arith.constant 0 : index
    %c0_10 = arith.constant 0 : index
    %12 = vector.load %arg5[%c0_9, %c0_10] : memref<1x32xf32, #tpu.memory_space<vmem>>, vector<1x32xf32>
    %13 = vector.broadcast %12 : vector<1x32xf32> to vector<8x32xf32>
    %14 = arith.addf %11, %13 : vector<8x32xf32>
    %cst_11 = arith.constant 0.000000e+00 : f32
    %15 = vector.broadcast %cst_11 : f32 to vector<8x32xf32>
    %16 = arith.maximumf %14, %15 : vector<8x32xf32>
    %17 = arith.truncf %16 : vector<8x32xf32> to vector<8x32xbf16>
    %c0_12 = arith.constant 0 : index
    %c0_13 = arith.constant 0 : index
    %18 = vector.load %arg6[%c0_12, %c0_13] : memref<32x128xbf16, #tpu.memory_space<vmem>>, vector<32x128xbf16>
    %cst_14 = arith.constant dense<0.000000e+00> : vector<8x128xf32>
    %19 = tpu.matmul %17, %18, %cst_14 {dimension_numbers = #tpu.dot_dimension_numbers<[1], [0], [0], [1], [0, 0, 1, 1], [], []>} : vector<8x32xbf16>, vector<32x128xbf16>, vector<8x128xf32> -> vector<8x128xf32>
    %c0_15 = arith.constant 0 : index
    %c0_16 = arith.constant 0 : index
    %20 = vector.load %arg7[%c0_15, %c0_16] : memref<1x128xf32, #tpu.memory_space<vmem>>, vector<1x128xf32>
    %21 = vector.broadcast %20 : vector<1x128xf32> to vector<8x128xf32>
    %22 = arith.addf %19, %21 : vector<8x128xf32>
    %23 = vector.extract_strided_slice %22 {offsets = [0, 0], sizes = [8, 4], strides = [1, 1]} : vector<8x128xf32> to vector<8x4xf32>
    %c0_17 = arith.constant 0 : index
    %c0_18 = arith.constant 0 : index
    %24 = vector.load %arg8[%c0_17, %c0_18] : memref<8x4xf32, #tpu.memory_space<vmem>>, vector<8x4xf32>
    tpu.vector_store %arg8[%c0_17, %c0_18], %23 {strides = array<i32>} : memref<8x4xf32, #tpu.memory_space<vmem>>, vector<8x4xf32>,
    return
  }
  func.func @transform_0(%arg0: i32) -> (i32, i32) {
    %c0_i32 = arith.constant 0 : i32
    %c0_i32_0 = arith.constant 0 : i32
    return %arg0, %c0_i32 : i32, i32
  }
  func.func @transform_1(%arg0: i32) -> (i32, i32) {
    %c0_i32 = arith.constant 0 : i32
    %c0_i32_0 = arith.constant 0 : i32
    %c0_i32_1 = arith.constant 0 : i32
    return %c0_i32, %c0_i32_0 : i32, i32
  }
  func.func @transform_2(%arg0: i32) -> (i32, i32) {
    %c0_i32 = arith.constant 0 : i32
    %c0_i32_0 = arith.constant 0 : i32
    %c0_i32_1 = arith.constant 0 : i32
    return %c0_i32, %c0_i32_0 : i32, i32
  }
  func.func @transform_3(%arg0: i32) -> (i32, i32) {
    %c0_i32 = arith.constant 0 : i32
    %c0_i32_0 = arith.constant 0 : i32
    %c0_i32_1 = arith.constant 0 : i32
    return %c0_i32, %c0_i32_0 : i32, i32
  }
  func.func @transform_4(%arg0: i32) -> (i32, i32) {
    %c0_i32 = arith.constant 0 : i32
    %c0_i32_0 = arith.constant 0 : i32
    %c0_i32_1 = arith.constant 0 : i32
    return %c0_i32, %c0_i32_0 : i32, i32
  }
  func.func @transform_5(%arg0: i32) -> (i32, i32) {
    %c0_i32 = arith.constant 0 : i32
    %c0_i32_0 = arith.constant 0 : i32
    %c0_i32_1 = arith.constant 0 : i32
    return %c0_i32, %c0_i32_0 : i32, i32
  }
  func.func @transform_6(%arg0: i32) -> (i32, i32) {
    %c0_i32 = arith.constant 0 : i32
    %c0_i32_0 = arith.constant 0 : i32
    %c0_i32_1 = arith.constant 0 : i32
    return %c0_i32, %c0_i32_0 : i32, i32
  }
  func.func @transform_7(%arg0: i32) -> (i32, i32) {
    %c0_i32 = arith.constant 0 : i32
    %c0_i32_0 = arith.constant 0 : i32
    return %arg0, %c0_i32 : i32, i32
  }
}

</mosaic_0001>

<bundles_post_ra>
// kernel: enhanced_nn_forward.1
= control target key start
LH: loop header
LB: loop body
LE: loop exit
PB: predicated region body
PF: predicated region fallthrough
CT: control target
= control target key end

     0   :  { %v306_v0 = vmov 0.0   ;;  %vm307_vm0 = vmmov 0   ;;  %vm44_vm1 = vcmask 130048   ;;  %vm129_vm2 = vcmask 523264   ;;  %s384_s1 = inlined_call_operand.vmem [shape: bf16[16,64], index: 1, kind: input, shape index: {}]   ;;  %s385_s0 = inlined_call_operand.vmem [shape: f32[8,16], index: 0, kind: input, shape index: {}]   ;;  %s386_s3 = inlined_call_operand.vmem [shape: bf16[64,32], index: 3, kind: input, shape index: {}]   ;;  %s387_s5 = inlined_call_operand.vmem [shape: bf16[32,128], index: 5, kind: input, shape index: {}]   ;;  %s388_s2 = inlined_call_operand.vmem [shape: f32[1,64], index: 2, kind: input, shape index: {}]   ;;  %s389_s4 = inlined_call_operand.vmem [shape: f32[1,32], index: 4, kind: input, shape index: {}]   ;;  %s390_s6 = inlined_call_operand.vmem [shape: f32[1,128], index: 6, kind: input, shape index: {}]   ;;  %s391_s7 = inlined_call_operand.vmem [shape: f32[8,4], index: 7, kind: output, shape index: {}]  }
   0x1   :  { %271 = vmatprep.subr.bf16.mxu0 %v306_v0  ;;  %v299_v1 = vld [vmem:[%s384_s1] sm:$0xff]   ;;  %273 = vmatprep.mubr.msk.bf16.mxu0 %vm307_vm0, %v306_v0  ;;  %v301_v5 = vld [vmem:[%s386_s3 + $0x8] sm:$0xff]   ;;  %v302_v6 = vld [vmem:[%s386_s3 + $0x10] sm:$0xff]   ;;  %vm198_vm3 = vcmask 261120   ;;  %vm242_vm4 = vcmask 31744  }
   0x2   :  { %v27_v2 = vld [vmem:[%s385_s0] sm:$0xff]  ;;  %277 = vmatprep.subr.bf16.mxu1 %v306_v0  ;;  %285 = vmatprep.mubr.msk.bf16.mxu1 %vm307_vm0, %v306_v0  ;;  %v303_v7 = vld [vmem:[%s386_s3 + $0x18] sm:$0xff]   ;;  %v305_v17 = vld [vmem:[%s387_s5 + $0x8] sm:$0xff]  }
   0x3   :  { %272 = vmatpush3.bf16.msra.mxu0 %v299_v1  ;;  %v28_v3 = vpack.c.bf16 %v27_v2, %v27_v2  ;;  %v300_v4 = vld [vmem:[%s386_s3] sm:$0xff]  }
   0x4   :  { %289 = vmatprep.subr.bf16.mxu0 %v306_v0  ;;  %278 = vmatpush3.bf16.msra.mxu1 %v300_v4  ;;  %v304_v8 = vld [vmem:[%s387_s5] sm:$0xff]  }
   0x5   :  { %279 = vmatprep.subr.bf16.mxu1 %v306_v0  ;;  %v248_v9 = vld [vmem:[%s388_s2] ss:$0 sm:$0xff] }
   0x6   :  { %274 = vmatmul.mubr.msk.bf16.vlgmr.msra.gmra.mrb[0].mxu0 %vm44_vm1, %v28_v3  ;;  %v251_v18 = vld [vmem:[%s389_s4] ss:$0 sm:$0xff] }
   0x7   :  { %293 = vmatprep.mubr.msk.bf16.mxu0 %vm307_vm0, %v306_v0  ;;  %290 = vmatpush3.bf16.msra.mxu0 %v304_v8  ;;  %v257_v26 = vld [vmem:[%s390_s6] ss:$0 sm:$0xff] }
   0x8   :  { %280 = vmatpush3.bf16.msra.mxu1 %v301_v5  ;;  %291 = vmatprep.subr.bf16.mxu0 %v306_v0 }
   0x9   :  { %281 = vmatprep.subr.bf16.mxu1 %v306_v0 }
   0xb   :  { %292 = vmatpush3.bf16.msra.mxu0 %v305_v17 }
   0xc   :  { %282 = vmatpush3.bf16.msra.mxu1 %v302_v6 }
   0xd   :  { %283 = vmatprep.subr.bf16.mxu1 %v306_v0 }
  0x10   :  { %284 = vmatpush3.bf16.msra.mxu1 %v303_v7 }
  0xd9   :  { %v82_v10 = vpop.f32.mrb[0].mxu0 }
  0xda   :  { %v83_v11 = vadd.f32 %v248_v9, %v82_v10  ;;  %v275_v12 = vpop.f32.mrb[1].mxu0 }
  0xdb   :  { %v85_v13 = vpop.f32.mrb[2].mxu0 }
  0xdc   :  { %v88_v14 = vmax.f32 %v83_v11, 0.0  ;;  %v276_v15 = vpop.f32.mrb[3].mxu0 }
  0xde   :  { %v89_v16 = vpack.c.bf16 %v88_v14, %v88_v14 }
  0xe0   :  { %286 = vmatmul.mubr.msk.bf16.vlgmr.msra.gmra.mrb[0].mxu1 %vm129_vm2, %v89_v16 }
 0x1b3   :  { %v167_v19 = vpop.f32.mrb[0].mxu1 }
 0x1b4   :  { %v168_v20 = vadd.f32 %v251_v18, %v167_v19  ;;  %v287_v21 = vpop.f32.mrb[1].mxu1 }
 0x1b5   :  { %v170_v22 = vpop.f32.mrb[2].mxu1 }
 0x1b6   :  { %v173_v23 = vmax.f32 %v168_v20, 0.0  ;;  %v288_v24 = vpop.f32.mrb[3].mxu1 }
 0x1b8   :  { %v174_v25 = vpack.c.bf16 %v173_v23, %v173_v23 }
 0x1ba   :  { %294 = vmatmul.mubr.msk.bf16.vlgmr.msra.gmra.mrb[4].mxu0 %vm198_vm3, %v174_v25 }
 0x28d   :  { %v236_v27 = vpop.f32.mrb[4].mxu0 }
 0x28e   :  { %v237_v28 = vadd.f32 %v257_v26, %v236_v27  ;;  %v295_v29 = vpop.f32.mrb[5].mxu0 }
 0x28f   :  { %v239_v30 = vpop.f32.mrb[6].mxu0 }
 0x290   :  { %243 = vst.msk [vmem:[%s391_s7] sm:$0xff] %vm242_vm4, %v237_v28  ;;  %v296_v31 = vpop.f32.mrb[7].mxu0 }

</bundles_post_ra>
